<compile_context>
chip_gen: v5e
topology: v5e:2x2
jax: 0.10.0
libtpu: 0.0.40
codegen_flags: <defaults>
</compile_context>

<pallas_src>
import jax
import jax.numpy as jnp
from jax.experimental import pallas as pl
from jax.experimental.pallas import tpu as pltpu

LANE = 128


def _round_up(n, m):
    return ((n + m - 1) // m) * m


def make_dqn_kernel(state_dim):
    """3-layer MLP kernel. state_dim is a static Python int (closed over)."""

    def kernel(x_ref, w1_ref, b1_ref, w2_ref, b2_ref, w3_ref, b3_ref, o_ref):
        x = x_ref[...]                       # (TB, state_dim) f32
        w1 = w1_ref[...]                     # (state_dim, H1) f32

        if state_dim <= 32:
            # Layer 1 as broadcast multiply-adds on the VPU (no degenerate
            # K=8 MXU pass); exact f32.
            acc = x[:, 0:1] * w1[0:1, :] + b1_ref[...]
            for k in range(1, state_dim):
                acc = acc + x[:, k:k + 1] * w1[k:k + 1, :]
        else:
            acc = jnp.dot(x, w1, preferred_element_type=jnp.float32) + b1_ref[...]
        h1 = jnp.maximum(acc, 0.0)                                    # f32 ReLU

        h2 = jnp.dot(h1.astype(jnp.bfloat16), w2_ref[...],
                     preferred_element_type=jnp.float32)
        h2 = jnp.maximum(h2 + b2_ref[...], 0.0)                       # f32 bias+ReLU

        out = jnp.dot(h2.astype(jnp.bfloat16), w3_ref[...],
                      preferred_element_type=jnp.float32)
        o_ref[...] = (out + b3_ref[...]).astype(o_ref.dtype)          # bf16 lane-dense store

    return kernel


def prepare_params(params):
    """One-time parameter prep. Cache the result in agent state; do NOT call per forward.

    * w1/b1 stay f32 (layer 1 runs on the VPU in f32).
    * w2/w3 pre-cast to bf16 (MXU operands), w3/b3 zero-padded to 128 output lanes.
    """
    w3, b3 = params["w3"], params["b3"]
    action_dim = w3.shape[1]
    n_out = _round_up(action_dim, LANE)
    if n_out != action_dim:
        w3 = jnp.pad(w3, ((0, 0), (0, n_out - action_dim)))
        b3 = jnp.pad(b3, ((0, 0), (0, n_out - action_dim)))
    return dict(
        w1=params["w1"].astype(jnp.float32),
        b1=params["b1"].astype(jnp.float32),
        w2=params["w2"].astype(jnp.bfloat16),
        b2=params["b2"].astype(jnp.float32),
        w3=w3.astype(jnp.bfloat16),
        b3=b3.astype(jnp.float32),
        action_dim=action_dim,
        n_out=n_out,
    )


def _choose_tb(B):
    """Batch tile size.

    Tiny batches: one tile, rounded to 16 sublanes (bf16 packing granularity).
    Larger batches: 256..1024-row tiles, keeping grid length >= 2 so the
    'parallel' batch axis can land one tile per TensorCore on v7x.
    """
    if B <= 256:
        return _round_up(max(B, 1), 16)
    half = (B + 1) // 2
    return min(1024, max(256, _round_up(half, 256)))


def dqn_forward(x, prep):
    """x: (B, state_dim) float32. prep: output of prepare_params().

    Returns (B, action_dim) float32 Q-values.
    """
    w1, b1, w2, b2, w3, b3 = (prep[k] for k in ("w1", "b1", "w2", "b2", "w3", "b3"))
    action_dim, n_out = prep["action_dim"], prep["n_out"]
    B, state_dim = x.shape
    H1 = w1.shape[1]
    H2 = w2.shape[1]

    TB = _choose_tb(B)
    B_pad = _round_up(B, TB)
    if B_pad != B:
        x = jnp.pad(x, ((0, B_pad - B), (0, 0)))
    grid = (B_pad // TB,)

    resident = lambda a: pl.BlockSpec(a.shape, lambda i: (0,) * a.ndim)

    flops = 2 * B_pad * (state_dim * H1 + H1 * H2 + H2 * n_out)
    bytes_accessed = (
        B_pad * state_dim * 4          # x (f32 in)
        + B_pad * n_out * 2            # out (bf16 writeback)
        + w1.size * 4 + w2.size * 2 + w3.size * 2
        + (b1.size + b2.size + b3.size) * 4
    )

    out = pl.pallas_call(
        make_dqn_kernel(state_dim),
        out_shape=jax.ShapeDtypeStruct((B_pad, n_out), jnp.bfloat16),
        grid=grid,
        in_specs=[
            pl.BlockSpec((TB, state_dim), lambda i: (i, 0)),   # x: tiled over batch
            resident(w1), resident(b1),                        # weights/biases stay
            resident(w2), resident(b2),                        # VMEM-resident across
            resident(w3), resident(b3),                        # all grid steps
        ],
        out_specs=pl.BlockSpec((TB, n_out), lambda i: (i, 0)),
        compiler_params=pltpu.CompilerParams(
            dimension_semantics=("parallel",),
            vmem_limit_bytes=32 << 20,   # actual usage is ~1-3 MiB even at TB=1024
        ),
        cost_estimate=pl.CostEstimate(
            flops=flops, transcendentals=0, bytes_accessed=bytes_accessed),
    )(x, w1, b1, w2, b2, w3, b3)

    # Slice off the batch padding + padded Q columns; cast only the tiny real
    # slice (B x action_dim) back to f32 for the caller.
    return out[:B, :action_dim].astype(jnp.float32)


def init_params(key, state_dim, hidden_sizes, action_dim):
    """Deterministic init mirroring mlp([state_dim]+hidden+[action_dim]) shapes.

    Weights stored (in_features, out_features): kernel computes x @ W + b,
    matching PyTorch's x @ W_pt.T + b.
    """
    sizes = [state_dim] + list(hidden_sizes) + [action_dim]
    params = {}
    for i in range(len(sizes) - 1):
        key, kw, kb = jax.random.split(key, 3)
        fan_in = sizes[i]
        bound = 1.0 / (fan_in ** 0.5)  # PyTorch Linear default init range
        params[f"w{i+1}"] = jax.random.uniform(
            kw, (sizes[i], sizes[i + 1]), jnp.float32, -bound, bound)
        params[f"b{i+1}"] = jax.random.uniform(
            kb, (1, sizes[i + 1]), jnp.float32, -bound, bound)
    return params


def reference_forward(x, prep, state_dim):
    """Mirrors the kernel's math: f32 layer 1 (same add order), bf16 MXU
    operands for layers 2/3 with f32 accumulation, bf16 output rounding."""
    w1, b1 = prep["w1"], prep["b1"]
    acc = x[:, 0:1] * w1[0:1, :] + b1
    for k in range(1, state_dim):
        acc = acc + x[:, k:k + 1] * w1[k:k + 1, :]
    h1 = jnp.maximum(acc, 0.0)
    h2 = jnp.maximum(
        jnp.dot(h1.astype(jnp.bfloat16), prep["w2"],
                preferred_element_type=jnp.float32) + prep["b2"], 0.0)
    out = (jnp.dot(h2.astype(jnp.bfloat16), prep["w3"],
                   preferred_element_type=jnp.float32) + prep["b3"])
    a = prep["action_dim"]
    return out[:, :a].astype(jnp.bfloat16).astype(jnp.float32)


if __name__ == "__main__":
    state_dim, action_dim = 8, 4
    hidden_sizes = [128, 128]

    key = jax.random.PRNGKey(0)
    key, kx1, kx2 = jax.random.split(key, 3)
    params = init_params(key, state_dim, hidden_sizes, action_dim)
    prep = prepare_params(params)   # one-time weight prep (cached)

    # Small batch (module default batch_size=32): single 32-row tile, grid=(1,).
    x_small = jax.random.normal(kx1, (32, state_dim), jnp.float32)
    out_small = jax.block_until_ready(dqn_forward(x_small, prep))
    ref_small = reference_forward(x_small, prep, state_dim)
    assert out_small.shape == (32, action_dim)
    assert jnp.allclose(out_small, ref_small, atol=2e-2, rtol=2e-2), "mismatch (B=32)"

    # Ragged larger batch: exercises batch padding + a 2-tile parallel grid
    # (one tile per TensorCore on v7x).
    x_big = jax.random.normal(kx2, (300, state_dim), jnp.float32)
    out_big = jax.block_until_ready(dqn_forward(x_big, prep))
    ref_big = reference_forward(x_big, prep, state_dim)
    assert out_big.shape == (300, action_dim)
    assert jnp.allclose(out_big, ref_big, atol=2e-2, rtol=2e-2), "mismatch (B=300)"

    # TODO(synk): train()/target_update()/ReplayBuffer involve optimizer state,
    # gradients and host-side sampling; only the q_net forward hot path is a
    # Pallas kernel.
    print("KERNEL_OK")
</pallas_src>

<mosaic_0001>
module attributes {stable_mosaic.version = 11 : i64} {
  func.func @kernel(%arg0: i32, %arg1: memref<32x8xf32, #tpu.memory_space<vmem>>, %arg2: memref<8x128xf32, #tpu.memory_space<vmem>>, %arg3: memref<1x128xf32, #tpu.memory_space<vmem>>, %arg4: memref<128x128xbf16, #tpu.memory_space<vmem>>, %arg5: memref<1x128xf32, #tpu.memory_space<vmem>>, %arg6: memref<128x128xbf16, #tpu.memory_space<vmem>>, %arg7: memref<1x128xf32, #tpu.memory_space<vmem>>, %arg8: memref<32x128xbf16, #tpu.memory_space<vmem>>) attributes {dimension_semantics = [#tpu.dimension_semantics<parallel>], iteration_bounds = array<i64: 1>, scalar_prefetch = 0 : i64, scratch_operands = 0 : i64, tpu.core_type = #tpu.core_type<tc>, window_params = [{transform_indices = @transform_0, window_bounds = array<i64: 32, 8>}, {pipeline_mode = #tpu.pipeline_mode<synchronous>, transform_indices = @transform_1, window_bounds = array<i64: 8, 128>}, {pipeline_mode = #tpu.pipeline_mode<synchronous>, transform_indices = @transform_2, window_bounds = array<i64: 1, 128>}, {pipeline_mode = #tpu.pipeline_mode<synchronous>, transform_indices = @transform_3, window_bounds = array<i64: 128, 128>}, {pipeline_mode = #tpu.pipeline_mode<synchronous>, transform_indices = @transform_4, window_bounds = array<i64: 1, 128>}, {pipeline_mode = #tpu.pipeline_mode<synchronous>, transform_indices = @transform_5, window_bounds = array<i64: 128, 128>}, {pipeline_mode = #tpu.pipeline_mode<synchronous>, transform_indices = @transform_6, window_bounds = array<i64: 1, 128>}, {transform_indices = @transform_7, window_bounds = array<i64: 32, 128>}]} {
    %c0 = arith.constant 0 : index
    %c0_0 = arith.constant 0 : index
    %0 = vector.load %arg1[%c0, %c0_0] : memref<32x8xf32, #tpu.memory_space<vmem>>, vector<32x8xf32>
    %c0_1 = arith.constant 0 : index
    %c0_2 = arith.constant 0 : index
    %1 = vector.load %arg2[%c0_1, %c0_2] : memref<8x128xf32, #tpu.memory_space<vmem>>, vector<8x128xf32>
    %2 = vector.extract_strided_slice %0 {offsets = [0, 0], sizes = [32, 1], strides = [1, 1]} : vector<32x8xf32> to vector<32x1xf32>
    %3 = vector.extract_strided_slice %1 {offsets = [0, 0], sizes = [1, 128], strides = [1, 1]} : vector<8x128xf32> to vector<1x128xf32>
    %4 = vector.broadcast %2 : vector<32x1xf32> to vector<32x128xf32>
    %5 = vector.broadcast %3 : vector<1x128xf32> to vector<32x128xf32>
    %6 = arith.mulf %4, %5 : vector<32x128xf32>
    %c0_3 = arith.constant 0 : index
    %c0_4 = arith.constant 0 : index
    %7 = vector.load %arg3[%c0_3, %c0_4] : memref<1x128xf32, #tpu.memory_space<vmem>>, vector<1x128xf32>
    %8 = vector.broadcast %7 : vector<1x128xf32> to vector<32x128xf32>
    %9 = arith.addf %6, %8 : vector<32x128xf32>
    %10 = vector.extract_strided_slice %0 {offsets = [0, 1], sizes = [32, 1], strides = [1, 1]} : vector<32x8xf32> to vector<32x1xf32>
    %11 = vector.extract_strided_slice %1 {offsets = [1, 0], sizes = [1, 128], strides = [1, 1]} : vector<8x128xf32> to vector<1x128xf32>
    %12 = vector.broadcast %10 : vector<32x1xf32> to vector<32x128xf32>
    %13 = vector.broadcast %11 : vector<1x128xf32> to vector<32x128xf32>
    %14 = arith.mulf %12, %13 : vector<32x128xf32>
    %15 = arith.addf %9, %14 : vector<32x128xf32>
    %16 = vector.extract_strided_slice %0 {offsets = [0, 2], sizes = [32, 1], strides = [1, 1]} : vector<32x8xf32> to vector<32x1xf32>
    %17 = vector.extract_strided_slice %1 {offsets = [2, 0], sizes = [1, 128], strides = [1, 1]} : vector<8x128xf32> to vector<1x128xf32>
    %18 = vector.broadcast %16 : vector<32x1xf32> to vector<32x128xf32>
    %19 = vector.broadcast %17 : vector<1x128xf32> to vector<32x128xf32>
    %20 = arith.mulf %18, %19 : vector<32x128xf32>
    %21 = arith.addf %15, %20 : vector<32x128xf32>
    %22 = vector.extract_strided_slice %0 {offsets = [0, 3], sizes = [32, 1], strides = [1, 1]} : vector<32x8xf32> to vector<32x1xf32>
    %23 = vector.extract_strided_slice %1 {offsets = [3, 0], sizes = [1, 128], strides = [1, 1]} : vector<8x128xf32> to vector<1x128xf32>
    %24 = vector.broadcast %22 : vector<32x1xf32> to vector<32x128xf32>
    %25 = vector.broadcast %23 : vector<1x128xf32> to vector<32x128xf32>
    %26 = arith.mulf %24, %25 : vector<32x128xf32>
    %27 = arith.addf %21, %26 : vector<32x128xf32>
    %28 = vector.extract_strided_slice %0 {offsets = [0, 4], sizes = [32, 1], strides = [1, 1]} : vector<32x8xf32> to vector<32x1xf32>
    %29 = vector.extract_strided_slice %1 {offsets = [4, 0], sizes = [1, 128], strides = [1, 1]} : vector<8x128xf32> to vector<1x128xf32>
    %30 = vector.broadcast %28 : vector<32x1xf32> to vector<32x128xf32>
    %31 = vector.broadcast %29 : vector<1x128xf32> to vector<32x128xf32>
    %32 = arith.mulf %30, %31 : vector<32x128xf32>
    %33 = arith.addf %27, %32 : vector<32x128xf32>
    %34 = vector.extract_strided_slice %0 {offsets = [0, 5], sizes = [32, 1], strides = [1, 1]} : vector<32x8xf32> to vector<32x1xf32>
    %35 = vector.extract_strided_slice %1 {offsets = [5, 0], sizes = [1, 128], strides = [1, 1]} : vector<8x128xf32> to vector<1x128xf32>
    %36 = vector.broadcast %34 : vector<32x1xf32> to vector<32x128xf32>
    %37 = vector.broadcast %35 : vector<1x128xf32> to vector<32x128xf32>
    %38 = arith.mulf %36, %37 : vector<32x128xf32>
    %39 = arith.addf %33, %38 : vector<32x128xf32>
    %40 = vector.extract_strided_slice %0 {offsets = [0, 6], sizes = [32, 1], strides = [1, 1]} : vector<32x8xf32> to vector<32x1xf32>
    %41 = vector.extract_strided_slice %1 {offsets = [6, 0], sizes = [1, 128], strides = [1, 1]} : vector<8x128xf32> to vector<1x128xf32>
    %42 = vector.broadcast %40 : vector<32x1xf32> to vector<32x128xf32>
    %43 = vector.broadcast %41 : vector<1x128xf32> to vector<32x128xf32>
    %44 = arith.mulf %42, %43 : vector<32x128xf32>
    %45 = arith.addf %39, %44 : vector<32x128xf32>
    %46 = vector.extract_strided_slice %0 {offsets = [0, 7], sizes = [32, 1], strides = [1, 1]} : vector<32x8xf32> to vector<32x1xf32>
    %47 = vector.extract_strided_slice %1 {offsets = [7, 0], sizes = [1, 128], strides = [1, 1]} : vector<8x128xf32> to vector<1x128xf32>
    %48 = vector.broadcast %46 : vector<32x1xf32> to vector<32x128xf32>
    %49 = vector.broadcast %47 : vector<1x128xf32> to vector<32x128xf32>
    %50 = arith.mulf %48, %49 : vector<32x128xf32>
    %51 = arith.addf %45, %50 : vector<32x128xf32>
    %cst = arith.constant 0.000000e+00 : f32
    %52 = vector.broadcast %cst : f32 to vector<32x128xf32>
    %53 = arith.maximumf %51, %52 : vector<32x128xf32>
    %54 = arith.truncf %53 : vector<32x128xf32> to vector<32x128xbf16>
    %c0_5 = arith.constant 0 : index
    %c0_6 = arith.constant 0 : index
    %55 = vector.load %arg4[%c0_5, %c0_6] : memref<128x128xbf16, #tpu.memory_space<vmem>>, vector<128x128xbf16>
    %cst_7 = arith.constant dense<0.000000e+00> : vector<32x128xf32>
    %56 = tpu.matmul %54, %55, %cst_7 {dimension_numbers = #tpu.dot_dimension_numbers<[1], [0], [0], [1], [0, 0, 1, 1], [], []>} : vector<32x128xbf16>, vector<128x128xbf16>, vector<32x128xf32> -> vector<32x128xf32>
    %c0_8 = arith.constant 0 : index
    %c0_9 = arith.constant 0 : index
    %57 = vector.load %arg5[%c0_8, %c0_9] : memref<1x128xf32, #tpu.memory_space<vmem>>, vector<1x128xf32>
    %58 = vector.broadcast %57 : vector<1x128xf32> to vector<32x128xf32>
    %59 = arith.addf %56, %58 : vector<32x128xf32>
    %cst_10 = arith.constant 0.000000e+00 : f32
    %60 = vector.broadcast %cst_10 : f32 to vector<32x128xf32>
    %61 = arith.maximumf %59, %60 : vector<32x128xf32>
    %62 = arith.truncf %61 : vector<32x128xf32> to vector<32x128xbf16>
    %c0_11 = arith.constant 0 : index
    %c0_12 = arith.constant 0 : index
    %63 = vector.load %arg6[%c0_11, %c0_12] : memref<128x128xbf16, #tpu.memory_space<vmem>>, vector<128x128xbf16>
    %cst_13 = arith.constant dense<0.000000e+00> : vector<32x128xf32>
    %64 = tpu.matmul %62, %63, %cst_13 {dimension_numbers = #tpu.dot_dimension_numbers<[1], [0], [0], [1], [0, 0, 1, 1], [], []>} : vector<32x128xbf16>, vector<128x128xbf16>, vector<32x128xf32> -> vector<32x128xf32>
    %c0_14 = arith.constant 0 : index
    %c0_15 = arith.constant 0 : index
    %65 = vector.load %arg7[%c0_14, %c0_15] : memref<1x128xf32, #tpu.memory_space<vmem>>, vector<1x128xf32>
    %66 = vector.broadcast %65 : vector<1x128xf32> to vector<32x128xf32>
    %67 = arith.addf %64, %66 : vector<32x128xf32>
    %68 = arith.truncf %67 : vector<32x128xf32> to vector<32x128xbf16>
    %c0_16 = arith.constant 0 : index
    %c0_17 = arith.constant 0 : index
    %69 = vector.load %arg8[%c0_16, %c0_17] : memref<32x128xbf16, #tpu.memory_space<vmem>>, vector<32x128xbf16>
    tpu.vector_store %arg8[%c0_16, %c0_17], %68 {strides = array<i32>} : memref<32x128xbf16, #tpu.memory_space<vmem>>, vector<32x128xbf16>,
    return
  }
  func.func @transform_0(%arg0: i32) -> (i32, i32) {
    %c0_i32 = arith.constant 0 : i32
    %c0_i32_0 = arith.constant 0 : i32
    return %arg0, %c0_i32 : i32, i32
  }
  func.func @transform_1(%arg0: i32) -> (i32, i32) {
    %c0_i32 = arith.constant 0 : i32
    %c0_i32_0 = arith.constant 0 : i32
    %c0_i32_1 = arith.constant 0 : i32
    return %c0_i32, %c0_i32_0 : i32, i32
  }
  func.func @transform_2(%arg0: i32) -> (i32, i32) {
    %c0_i32 = arith.constant 0 : i32
    %c0_i32_0 = arith.constant 0 : i32
    %c0_i32_1 = arith.constant 0 : i32
    return %c0_i32, %c0_i32_0 : i32, i32
  }
  func.func @transform_3(%arg0: i32) -> (i32, i32) {
    %c0_i32 = arith.constant 0 : i32
    %c0_i32_0 = arith.constant 0 : i32
    %c0_i32_1 = arith.constant 0 : i32
    return %c0_i32, %c0_i32_0 : i32, i32
  }
  func.func @transform_4(%arg0: i32) -> (i32, i32) {
    %c0_i32 = arith.constant 0 : i32
    %c0_i32_0 = arith.constant 0 : i32
    %c0_i32_1 = arith.constant 0 : i32
    return %c0_i32, %c0_i32_0 : i32, i32
  }
  func.func @transform_5(%arg0: i32) -> (i32, i32) {
    %c0_i32 = arith.constant 0 : i32
    %c0_i32_0 = arith.constant 0 : i32
    %c0_i32_1 = arith.constant 0 : i32
    return %c0_i32, %c0_i32_0 : i32, i32
  }
  func.func @transform_6(%arg0: i32) -> (i32, i32) {
    %c0_i32 = arith.constant 0 : i32
    %c0_i32_0 = arith.constant 0 : i32
    %c0_i32_1 = arith.constant 0 : i32
    return %c0_i32, %c0_i32_0 : i32, i32
  }
  func.func @transform_7(%arg0: i32) -> (i32, i32) {
    %c0_i32 = arith.constant 0 : i32
    %c0_i32_0 = arith.constant 0 : i32
    return %arg0, %c0_i32 : i32, i32
  }
}

</mosaic_0001>

<bundles_post_ra>
// kernel: tpu_custom_call.1
= control target key start
LH: loop header
LB: loop body
LE: loop exit
PB: predicated region body
PF: predicated region fallthrough
CT: control target
= control target key end

     0   :  { %12 = vsyncpa [#allocation3], 0  ;;  %s873_s0 = inlined_call_operand.vmem [shape: f32[32,8], index: 0, kind: input, shape index: {}]   ;;  %s874_s1 = inlined_call_operand.vmem [shape: f32[8,128], index: 1, kind: input, shape index: {}]   ;;  %s875_s2 = inlined_call_operand.vmem [shape: f32[1,128], index: 2, kind: input, shape index: {}]   ;;  %s876_s3 = inlined_call_operand.hbm [shape: bf16[128,128], index: 3, kind: input, shape index: {}]   ;;  %s877_s4 = inlined_call_operand.vmem [shape: f32[1,128], index: 4, kind: input, shape index: {}]   ;;  %s878_s5 = inlined_call_operand.hbm [shape: bf16[128,128], index: 5, kind: input, shape index: {}]   ;;  %s879_s6 = inlined_call_operand.vmem [shape: f32[1,128], index: 6, kind: input, shape index: {}]   ;;  %s880_s7 = inlined_call_operand.hbm [shape: bf16[32,128], index: 7, kind: output, shape index: {}]  }
   0x1   :  { %13 = vsyncpa [#allocation6], 0 }
   0x2   :  { %14 = vsyncpa [#allocation4], 0  ;;  %s25_s26 = sshll.u32 %s876_s3, 4  ;;  %s715_s27 = smov [#allocation2]   ;;  %s26_s26 = int_to_ptr.hbm [resolvable:$true] %s25_s26 }
   0x3   :  { %s27_s28 = sshll.u32 %s715_s27, 4  ;;  %s40_s8 = sshll.u32 %s878_s5, 4  ;;  %s28_s28 = int_to_ptr.vmem [resolvable:$true] %s27_s28  ;;  %s41_s8 = int_to_ptr.hbm [resolvable:$true] %s40_s8 }
   0x4   :  { %s716_s9 = smov 64   ;;  %s717_s10 = smov 4  }
   0x5   :  { %33 = dma.hbm_to_vmem [thread:$0]  %s26_s26, 1024, %s28_s28, [#allocation3], %s716_s9, %s716_s9, %s717_s10  }
   0x6   :  { %s718_s11 = smov [#allocation5]  }
   0x7   :  { %s42_s12 = sshll.u32 %s718_s11, 4  ;;  %s43_s12 = int_to_ptr.vmem [resolvable:$true] %s42_s12 }
   0x8   :  { %48 = dma.hbm_to_vmem [thread:$0]  %s41_s8, 1024, %s43_s12, [#allocation6], %s716_s9, %s716_s9, %s717_s10  }
   0x9   :  { %709 = dma.done.wait [#allocation3], 1024  }
   0xa   :  { %710 = vsyncadd [#allocation3], 4294966272 }
   0xb   :  { %711 = dma.done.wait [#allocation6], 1024  }
   0xc   :  { %712 = vsyncadd [#allocation6], 4294966272  ;;  %v719_v0 = vmov 1   ;;  %v720_v1 = vmov 0   ;;  %v721_v2 = vmov 2   ;;  %v61_v3 = vld [vmem:[%s873_s0 + $0x10] sm:$0xff] }
   0xd   :  { %607 = vset.pattern.permute.xlu1 %v719_v0  ;;  %606 = vset.pattern.permute.xlu0 %v720_v1  ;;  %v62_v4 = vld [vmem:[%s873_s0 + $0x18] sm:$0xff]  ;;  %v722_v5 = vmov 3   ;;  %v723_v6 = vmov 4   ;;  %v59_v7 = vld [vmem:[%s873_s0] sm:$0xff]  ;;  %v724_v8 = vmov 5   ;;  %v60_v9 = vld [vmem:[%s873_s0 + $0x8] sm:$0xff] }
   0xe   :  { %608 = vset.pattern.permute.xlu2 %v721_v2  ;;  %106 = vperm.xlu1 %607, %v61_v3   ;;  %v725_v10 = vmov 6   ;;  %v726_v11 = vmov 7   ;;  %v557_v17 = vld [vmem:[#allocation2 + $0x38] sm:$0xff]  ;;  %v556_v19 = vld [vmem:[#allocation2 + $0x30] sm:$0xff]  ;;  %v555_v21 = vld [vmem:[#allocation2 + $0x28] sm:$0xff]  ;;  %s472_s27 = sshll.u32 %s880_s7, 4  ;;  %s473_s27 = int_to_ptr.hbm [resolvable:$true] %s472_s27 }
   0xf   :  { %76 = vperm.xlu0 %606, %v61_v3   ;;  %131 = vperm.xlu2 %608, %v61_v3   ;;  %v554_v23 = vld [vmem:[#allocation2 + $0x20] sm:$0xff]  ;;  %v553_v25 = vld [vmem:[#allocation2 + $0x18] sm:$0xff]  ;;  %v552_v28 = vld [vmem:[#allocation2 + $0x10] sm:$0xff] }
  0x10   :  { %577 = vmatpush.bf16.msra.mxu2 %v557_v17  ;;  %346 = vmatpush.bf16.msra.mxu0 %v557_v17  ;;  %v63_v29 = vld [vmem:[%s874_s1] sm:$0xff]  ;;  %v551_v31 = vld [vmem:[#allocation2 + $0x8] sm:$0xff] }
  0x11   :  { %v797_v32 = vperm.slane %v63_v29, 0  ;;  %v550_v34 = vld [vmem:[#allocation2] sm:$0xff]  ;;  %v807_v38 = vperm.slane %v63_v29, 1  ;;  %v810_v41 = vperm.slane %v63_v29, 2  ;;  %v814_v44 = vperm.slane %v63_v29, 3 }
  0x12   :  { %v804_v35 = vld [vmem:[%s875_s2] ss:$0 sm:$0xff]  ;;  %v819_v49 = vperm.slane %v63_v29, 4  ;;  %v825_v56 = vperm.slane %v63_v29, 5  ;;  %v829_v61 = vperm.slane %v63_v29, 6 }
  0x14   :  { %578 = vmatpush.bf16.msra.mxu2 %v556_v19  ;;  %347 = vmatpush.bf16.msra.mxu0 %v556_v19 }
  0x16   :  { %110 = vperm.xlu1 %607, %v62_v4  }
  0x17   :  { %81 = vperm.xlu0 %606, %v62_v4   ;;  %135 = vperm.xlu2 %608, %v62_v4  }
  0x18   :  { %579 = vmatpush.bf16.msra.mxu2 %v555_v21  ;;  %348 = vmatpush.bf16.msra.mxu0 %v555_v21 }
  0x1c   :  { %580 = vmatpush.bf16.msra.mxu2 %v554_v23  ;;  %349 = vmatpush.bf16.msra.mxu0 %v554_v23 }
  0x1e   :  { %610 = vset.pattern.permute.xlu1 %v722_v5 }
  0x1f   :  { %609 = vset.pattern.permute.xlu0 %v722_v5  ;;  %611 = vset.pattern.permute.xlu2 %v723_v6 }
  0x20   :  { %160 = vperm.xlu1 %610, %v62_v4   ;;  %156 = vperm.xlu0 %609, %v61_v3  }
  0x21   :  { %181 = vperm.xlu2 %611, %v61_v3   ;;  %581 = vmatpush.bf16.msra.mxu2 %v553_v25 }
  0x22   :  { %350 = vmatpush.bf16.msra.mxu0 %v553_v25 }
  0x25   :  { %582 = vmatpush.bf16.msra.mxu2 %v552_v28 }
  0x26   :  { %351 = vmatpush.bf16.msra.mxu0 %v552_v28 }
  0x28   :  { %612 = vset.pattern.permute.xlu1 %v723_v6  ;;  %618 = vset.pattern.permute.xlu0 %v719_v0 }
  0x29   :  { %613 = vset.pattern.permute.xlu2 %v724_v8  ;;  %185 = vperm.xlu1 %612, %v62_v4  }
  0x2a   :  { %98 = vperm.xlu0 %618, %v59_v7   ;;  %206 = vperm.xlu2 %613, %v61_v3  }
  0x2b   :  { %583 = vmatpush.bf16.msra.mxu2 %v551_v31  ;;  %352 = vmatpush.bf16.msra.mxu0 %v551_v31 }
  0x2f   :  { %584 = vmatpush.bf16.msra.mxu2 %v550_v34  ;;  %353 = vmatpush.bf16.msra.mxu0 %v550_v34  ;;  %v564_v34 = vld [vmem:[#allocation5 + $0x30] sm:$0xff] }
  0x31   :  { %614 = vset.pattern.permute.xlu1 %v720_v1 }
  0x32   :  { %623 = vset.pattern.permute.xlu0 %v721_v2  ;;  %615 = vset.pattern.permute.xlu2 %v720_v1 }
  0x33   :  { %127 = vperm.xlu0 %623, %v60_v9   ;;  %66 = vperm.xlu1 %614, %v59_v7  }
  0x34   :  { %71 = vperm.xlu2 %615, %v60_v9  }
  0x3b   :  { %624 = vset.pattern.permute.xlu0 %v724_v8  ;;  %616 = vset.pattern.permute.xlu1 %v725_v10 }
  0x3c   :  { %617 = vset.pattern.permute.xlu2 %v725_v10  ;;  %210 = vperm.xlu0 %624, %v62_v4  }
  0x3d   :  { %231 = vperm.xlu1 %616, %v61_v3   ;;  %235 = vperm.xlu2 %617, %v62_v4  }
  0x44   :  { %198 = vperm.xlu0 %624, %v59_v7  }
  0x45   :  { %619 = vset.pattern.permute.xlu1 %v719_v0  ;;  %620 = vset.pattern.permute.xlu2 %v726_v11 }
  0x46   :  { %102 = vperm.xlu1 %619, %v60_v9   ;;  %256 = vperm.xlu2 %620, %v61_v3  }
  0x4c   :  { %633 = vset.pattern.permute.xlu0 %v726_v11 }
  0x4d   :  { %252 = vperm.xlu0 %633, %v60_v9  }
  0x4e   :  { %621 = vset.pattern.permute.xlu1 %v726_v11  ;;  %622 = vset.pattern.permute.xlu2 %v721_v2 }
  0x4f   :  { %260 = vperm.xlu1 %621, %v62_v4   ;;  %123 = vperm.xlu2 %622, %v59_v7  }
  0x57   :  { %625 = vset.pattern.permute.xlu1 %v722_v5  ;;  %626 = vset.pattern.permute.xlu2 %v722_v5  ;;  %v833_v5 = vperm.slane %v63_v29, 7  ;;  %v565_v29 = vld [vmem:[#allocation5 + $0x38] sm:$0xff] }
  0x58   :  { %148 = vperm.xlu1 %625, %v59_v7   ;;  %152 = vperm.xlu2 %626, %v60_v9  }
  0x59   :  { %585 = vmatpush.bf16.msra.mxu3 %v565_v29  ;;  %439 = vmatpush.bf16.msra.mxu1 %v565_v29 }
  0x5d   :  { %586 = vmatpush.bf16.msra.mxu3 %v564_v34  ;;  %440 = vmatpush.bf16.msra.mxu1 %v564_v34 }
  0x60   :  { %627 = vset.pattern.permute.xlu1 %v723_v6  ;;  %628 = vset.pattern.permute.xlu2 %v723_v6 }
  0x61   :  { %173 = vperm.xlu1 %627, %v59_v7   ;;  %177 = vperm.xlu2 %628, %v60_v9  }
  0x69   :  { %629 = vset.pattern.permute.xlu1 %v724_v8  ;;  %630 = vset.pattern.permute.xlu2 %v725_v10  ;;  %v132_v12 = vpop.permute.xlu2 %131 }
  0x6a   :  { %202 = vperm.xlu1 %629, %v60_v9   ;;  %223 = vperm.xlu2 %630, %v59_v7   ;;  %v141_v48 = vmul.f32 %v810_v41, %v132_v12 }
  0x71   :  { %v136_v13 = vpop.permute.xlu2 %135 }
  0x72   :  { %631 = vset.pattern.permute.xlu1 %v725_v10  ;;  %632 = vset.pattern.permute.xlu2 %v726_v11  ;;  %v142_v59 = vmul.f32 %v810_v41, %v136_v13 }
  0x73   :  { %227 = vperm.xlu1 %631, %v60_v9   ;;  %248 = vperm.xlu2 %632, %v59_v7  }
  0x7b   :  { %v182_v18 = vpop.permute.xlu2 %181 }
  0x7c   :  { %v191_v55 = vmul.f32 %v819_v49, %v182_v18 }
  0x80   :  { %v107_v14 = vpop.permute.xlu1 %106 }
  0x81   :  { %v77_v15 = vpop.permute.xlu0 %76  ;;  %v116_v42 = vmul.f32 %v807_v38, %v107_v14 }
  0x82   :  { %v87_v36 = vmul.f32 %v797_v32, %v77_v15 }
  0x84   :  { %v207_v24 = vpop.permute.xlu2 %206  ;;  %v95_v40 = vadd.f32 %v804_v35, %v87_v36 }
  0x85   :  { %v216_v63 = vmul.f32 %v825_v56, %v207_v24 }
  0x86   :  { %v120_v46 = vadd.f32 %v116_v42, %v95_v40 }
  0x88   :  { %v111_v16 = vpop.permute.xlu1 %110  ;;  %v145_v53 = vadd.f32 %v141_v48, %v120_v46 }
  0x89   :  { %v82_v20 = vpop.permute.xlu0 %81  ;;  %v117_v52 = vmul.f32 %v807_v38, %v111_v16 }
  0x8a   :  { %v88_v43 = vmul.f32 %v797_v32, %v82_v20 }
  0x8c   :  { %v96_v50 = vadd.f32 %v804_v35, %v88_v43 }
  0x8e   :  { %v795_v30 = vpop.permute.xlu2 %71  ;;  %v121_v57 = vadd.f32 %v117_v52, %v96_v50  ;;  %v562_v52 = vld [vmem:[#allocation5 + $0x20] sm:$0xff] }
  0x8f   :  { %v86_v31 = vmul.f32 %v797_v32, %v795_v30 }
  0x90   :  { %v146_v0 = vadd.f32 %v142_v59, %v121_v57 }
  0x92   :  { %v161_v22 = vpop.permute.xlu1 %160  ;;  %v157_v26 = vpop.permute.xlu0 %156 }
  0x93   :  { %v166_v51 = vmul.f32 %v814_v44, %v157_v26  ;;  %v167_v60 = vmul.f32 %v814_v44, %v161_v22 }
  0x95   :  { %v170_v58 = vadd.f32 %v166_v51, %v145_v53  ;;  %v171_v4 = vadd.f32 %v167_v60, %v146_v0 }
  0x97   :  { %v236_v39 = vpop.permute.xlu2 %235  ;;  %v195_v1 = vadd.f32 %v191_v55, %v170_v58 }
  0x98   :  { %v242_v11 = vmul.f32 %v829_v61, %v236_v39 }
  0x99   :  { %v220_v9 = vadd.f32 %v216_v63, %v195_v1 }
  0x9b   :  { %v186_v27 = vpop.permute.xlu1 %185 }
  0x9c   :  { %v799_v33 = vpop.permute.xlu0 %98  ;;  %v192_v2 = vmul.f32 %v819_v49, %v186_v27 }
  0x9d   :  { %v114_v27 = vmul.f32 %v807_v38, %v799_v33  ;;  %v563_v33 = vld [vmem:[#allocation5 + $0x28] sm:$0xff] }
  0x9e   :  { %v196_v8 = vadd.f32 %v192_v2, %v171_v4  ;;  %587 = vmatpush.bf16.msra.mxu3 %v563_v33  ;;  %441 = vmatpush.bf16.msra.mxu1 %v563_v33 }
  0xa0   :  { %v257_v54 = vpop.permute.xlu2 %256 }
  0xa1   :  { %v266_v12 = vmul.f32 %v833_v5, %v257_v54 }
  0xa2   :  { %588 = vmatpush.bf16.msra.mxu3 %v562_v52  ;;  %442 = vmatpush.bf16.msra.mxu1 %v562_v52 }
  0xa5   :  { %v67_v37 = vpop.permute.xlu1 %66  ;;  %v816_v45 = vpop.permute.xlu0 %127 }
  0xa6   :  { %v85_v25 = vmul.f32 %v797_v32, %v67_v37  ;;  %v94_v37 = vadd.f32 %v804_v35, %v86_v31  ;;  %v140_v30 = vmul.f32 %v810_v41, %v816_v45 }
  0xa8   :  { %v93_v28 = vadd.f32 %v804_v35, %v85_v25 }
  0xa9   :  { %v124_v10 = vpop.permute.xlu2 %123 }
  0xaa   :  { %v118_v39 = vadd.f32 %v114_v27, %v93_v28  ;;  %v139_v40 = vmul.f32 %v810_v41, %v124_v10  ;;  %v636_v28 = vld [vmem:[%s879_s6] ss:$0 sm:$0xff] }
  0xac   :  { %v143_v32 = vadd.f32 %v139_v40, %v118_v39 }
  0xae   :  { %v211_v62 = vpop.permute.xlu0 %210 }
  0xaf   :  { %v232_v47 = vpop.permute.xlu1 %231  ;;  %v217_v6 = vmul.f32 %v825_v56, %v211_v62 }
  0xb0   :  { %v241_v7 = vmul.f32 %v829_v61, %v232_v47 }
  0xb1   :  { %v221_v13 = vadd.f32 %v217_v6, %v196_v8 }
  0xb2   :  { %v245_v14 = vadd.f32 %v241_v7, %v220_v9  ;;  %v153_v20 = vpop.permute.xlu2 %152 }
  0xb3   :  { %v246_v16 = vadd.f32 %v242_v11, %v221_v13  ;;  %v165_v35 = vmul.f32 %v814_v44, %v153_v20  ;;  %v561_v11 = vld [vmem:[#allocation5 + $0x18] sm:$0xff]  ;;  %v558_v13 = vld [vmem:[#allocation5] sm:$0xff] }
  0xb4   :  { %v270_v18 = vadd.f32 %v266_v12, %v245_v14  ;;  %589 = vmatpush.bf16.msra.mxu3 %v561_v11  ;;  %443 = vmatpush.bf16.msra.mxu1 %v561_v11  ;;  %v559_v12 = vld [vmem:[#allocation5 + $0x8] sm:$0xff] }
  0xb6   :  { %v274_v22 = vmax.f32 %v270_v18, 0.0  ;;  %v199_v50 = vpop.permute.xlu0 %198 }
  0xb7   :  { %v214_v54 = vmul.f32 %v825_v56, %v199_v50 }
  0xb8   :  { %v103_v3 = vpop.permute.xlu1 %102 }
  0xb9   :  { %v115_v42 = vmul.f32 %v807_v38, %v103_v3 }
  0xbb   :  { %v178_v26 = vpop.permute.xlu2 %177  ;;  %v119_v47 = vadd.f32 %v115_v42, %v94_v37 }
  0xbc   :  { %v190_v41 = vmul.f32 %v819_v49, %v178_v26 }
  0xbd   :  { %v144_v38 = vadd.f32 %v140_v30, %v119_v47 }
  0xbf   :  { %v169_v57 = vadd.f32 %v165_v35, %v144_v38  ;;  %v253_v62 = vpop.permute.xlu0 %252 }
  0xc0   :  { %v265_v4 = vmul.f32 %v833_v5, %v253_v62 }
  0xc1   :  { %v261_v15 = vpop.permute.xlu1 %260  ;;  %v194_v63 = vadd.f32 %v190_v41, %v169_v57 }
  0xc2   :  { %v267_v17 = vmul.f32 %v833_v5, %v261_v15 }
  0xc4   :  { %v271_v19 = vadd.f32 %v267_v17, %v246_v16  ;;  %v224_v46 = vpop.permute.xlu2 %223 }
  0xc5   :  { %v239_v45 = vmul.f32 %v829_v61, %v224_v46 }
  0xc6   :  { %v275_v21 = vmax.f32 %v271_v19, 0.0 }
  0xc8   :  { %v277_v23 = vpack.c.bf16 %v275_v21, %v274_v22 }
  0xca   :  { %359 = vmatmul.bf16.vlgmr.msra.gmra.mxu2 %v277_v23  ;;  %v149_v24 = vpop.permute.xlu1 %148 }
  0xcb   :  { %v164_v43 = vmul.f32 %v814_v44, %v149_v24 }
  0xcd   :  { %v168_v51 = vadd.f32 %v164_v43, %v143_v32  ;;  %v249_v59 = vpop.permute.xlu2 %248 }
  0xce   :  { %v264_v44 = vmul.f32 %v833_v5, %v249_v59  ;;  %v635_v5 = vld [vmem:[%s877_s4] ss:$0 sm:$0xff]  ;;  %s727_s4 = smov [#allocation7]  }
  0xcf   :  { %s470_s24 = sshll.u32 %s727_s4, 4  ;;  %s471_s24 = int_to_ptr.vmem [resolvable:$true] %s470_s24 }
  0xd3   :  { %v174_v36 = vpop.permute.xlu1 %173 }
  0xd4   :  { %v189_v48 = vmul.f32 %v819_v49, %v174_v36 }
  0xd6   :  { %v193_v53 = vadd.f32 %v189_v48, %v168_v51 }
  0xd8   :  { %v218_v58 = vadd.f32 %v214_v54, %v193_v53 }
  0xda   :  { %v243_v0 = vadd.f32 %v239_v45, %v218_v58 }
  0xdc   :  { %v203_v55 = vpop.permute.xlu1 %202  ;;  %v268_v6 = vadd.f32 %v264_v44, %v243_v0 }
  0xdd   :  { %v215_v60 = vmul.f32 %v825_v56, %v203_v55  ;;  %v560_v56 = vld [vmem:[#allocation5 + $0x10] sm:$0xff] }
  0xde   :  { %v272_v8 = vmax.f32 %v268_v6, 0.0  ;;  %590 = vmatpush.bf16.msra.mxu3 %v560_v56  ;;  %444 = vmatpush.bf16.msra.mxu1 %v560_v56 }
  0xdf   :  { %v219_v2 = vadd.f32 %v215_v60, %v194_v63 }
  0xe2   :  { %591 = vmatpush.bf16.msra.mxu3 %v559_v12  ;;  %445 = vmatpush.bf16.msra.mxu1 %v559_v12 }
  0xe5   :  { %v228_v1 = vpop.permute.xlu1 %227 }
  0xe6   :  { %v240_v3 = vmul.f32 %v829_v61, %v228_v1  ;;  %592 = vmatpush.bf16.msra.mxu3 %v558_v13  ;;  %446 = vmatpush.bf16.msra.mxu1 %v558_v13 }
  0xe8   :  { %v244_v7 = vadd.f32 %v240_v3, %v219_v2 }
  0xea   :  { %v269_v49 = vadd.f32 %v265_v4, %v244_v7 }
  0xec   :  { %v273_v9 = vmax.f32 %v269_v49, 0.0 }
  0xee   :  { %v276_v10 = vpack.c.bf16 %v273_v9, %v272_v8 }
  0xf0   :  { %354 = vmatmul.bf16.vlgmr.msra.gmra.mxu0 %v276_v10 }
 0x14d   :  { %v360_v61 = vpop.f32.mrf.mxu2 }
 0x14e   :  { %v361_v14 = vadd.f32 %v635_v5, %v360_v61 }
 0x150   :  { %v367_v17 = vmax.f32 %v361_v14, 0.0 }
 0x155   :  { %v362_v15 = vpop.f32.mrf.mxu2 }
 0x156   :  { %v363_v16 = vadd.f32 %v635_v5, %v362_v15 }
 0x158   :  { %v368_v18 = vmax.f32 %v363_v16, 0.0 }
 0x15a   :  { %v370_v19 = vpack.c.bf16 %v368_v18, %v367_v17 }
 0x15c   :  { %452 = vmatmul.bf16.vlgmr.msra.gmra.mxu3 %v370_v19 }
 0x16d   :  { %v355_v20 = vpop.f32.mrf.mxu0 }
 0x16e   :  { %v356_v21 = vadd.f32 %v635_v5, %v355_v20 }
 0x170   :  { %v365_v24 = vmax.f32 %v356_v21, 0.0 }
 0x175   :  { %v357_v22 = vpop.f32.mrf.mxu0 }
 0x176   :  { %v358_v23 = vadd.f32 %v635_v5, %v357_v22 }
 0x178   :  { %v366_v25 = vmax.f32 %v358_v23, 0.0 }
 0x17a   :  { %v369_v26 = vpack.c.bf16 %v366_v25, %v365_v24 }
 0x17c   :  { %447 = vmatmul.bf16.vlgmr.msra.gmra.mxu1 %v369_v26 }
 0x1df   :  { %v453_v27 = vpop.f32.mrf.mxu3 }
 0x1e0   :  { %v454_v31 = vadd.f32 %v636_v28, %v453_v27 }
 0x1e7   :  { %v455_v29 = vpop.f32.mrf.mxu3 }
 0x1e8   :  { %v456_v34 = vadd.f32 %v636_v28, %v455_v29 }
 0x1ea   :  { %v574_v36 = vpack.c.bf16 %v456_v34, %v454_v31 }
 0x1ec   :  { %576 = vst [vmem:[#allocation7 + $0x8] sm:$0xff] %v574_v36  }
 0x1f9   :  { %v448_v39 = vpop.f32.mrf.mxu1 }
 0x1fa   :  { %v449_v42 = vadd.f32 %v636_v28, %v448_v39 }
 0x201   :  { %v450_v40 = vpop.f32.mrf.mxu1 }
 0x202   :  { %v451_v37 = vadd.f32 %v636_v28, %v450_v40 }
 0x204   :  { %v569_v43 = vpack.c.bf16 %v451_v37, %v449_v42 }
 0x206   :  { %570 = vst [vmem:[#allocation7] sm:$0xff] %v569_v43  }
 0x207   :  { %478 = dma.vmem_to_hbm [thread:$0]  %s471_s24, 256, %s473_s27, [#allocation4], %s716_s9, %s716_s9, %s717_s10  }
 0x208   :  { %713 = dma.done.wait [#allocation4], 256  }
 0x209   :  { %714 = vsyncadd [#allocation4], 4294967040 }
 0x20a   :  { %483 = vsyncpa [#allocation3], 1 }
 0x20b   :  { %484 = vsyncpa [#allocation6], 1 }
 0x20c   :  { %485 = vsyncpa [#allocation4], 1 }

</bundles_post_ra>
